<compile_context>
chip_gen: v6e
topology: v6e:2x2x1
jax: 0.10.0
libtpu: 0.0.40
codegen_flags: <defaults>
</compile_context>

<pallas_src>
import jax
import jax.numpy as jnp
from jax.experimental import pallas as pl
from jax.experimental.pallas import tpu as pltpu


def _round_up(x, m):
    return ((x + m - 1) // m) * m


def _cdiv(a, b):
    return -(-a // b)


def mlp_kernel(x_ref, w1_ref, b1_ref, w2_ref, b2_ref,
               w3_ref, b3_ref, w4_ref, b4_ref, o_ref):
    # x_ref: (tb, n_features) -- the input's natural layout (one contiguous DMA).
    x = x_ref[...]

    # fc1: contract the feature axis of both operands (W1 @ x^T) -> (16, tb).
    # Result is already lane-dense (batch on lanes); no wrapper transpose needed.
    h = jax.lax.dot_general(
        w1_ref[...], x, (((1,), (1,)), ((), ())),
        preferred_element_type=jnp.float32) + b1_ref[...]
    h = jnp.maximum(h, 0.0)
    # fc2: (8, 16) @ (16, tb) -> (8, tb)
    h = jnp.dot(w2_ref[...], h, preferred_element_type=jnp.float32) + b2_ref[...]
    h = jnp.maximum(h, 0.0)
    # fc3: (4, 8) @ (8, tb) -> (4, tb)
    h = jnp.dot(w3_ref[...], h, preferred_element_type=jnp.float32) + b3_ref[...]
    h = jnp.maximum(h, 0.0)
    # fc4 + sigmoid: (1, 4) @ (4, tb) -> (1, tb), lane-dense output store.
    z = jnp.dot(w4_ref[...], h, preferred_element_type=jnp.float32) + b4_ref[...]
    o_ref[...] = jax.nn.sigmoid(z).astype(o_ref.dtype)


def net_forward(x, params, *, max_tile_b=16384, vmem_budget_bytes=24 << 20):
    """x: (B, n_features). params: PyTorch-layout weights/biases.

    Returns (B, 1) float32, matching Net.forward.
    """
    B, n_features = x.shape
    itemsize = x.dtype.itemsize

    ws = [params[f"w{i}"] for i in (1, 2, 3, 4)]                              # (out, in)
    bs = [params[f"b{i}"].reshape(-1, 1).astype(jnp.float32) for i in (1, 2, 3, 4)]
    if x.dtype != jnp.float32:
        # bf16-at-rest streaming: feed fc1's MXU directly in the input dtype
        # (f32 accumulation via preferred_element_type); no in-kernel up-cast.
        ws = [ws[0].astype(x.dtype)] + ws[1:]

    # ---- tile-size selection (VMEM-budgeted, v7x-aware) -------------------
    # Per-batch-column VMEM footprint: double-buffered x tile + f32
    # intermediates (h1,h2,h3,z ~ 29 floats + fc1 staging ~ n_features) +
    # double-buffered (1, tb) output block.
    per_col = 2 * n_features * itemsize + (n_features + 16 + 8 + 4 + 1) * 4 + 2 * 4
    budget_tb = max(128, min(max_tile_b, vmem_budget_bytes // per_col) // 128 * 128)

    if B <= budget_tb:
        if B >= 4096:
            # Big enough batch: use >= 2 blocks so v7x's two TensorCores both
            # get work on the "parallel" batch axis (no-op on v5e/v6e).
            tb = min(budget_tb, _round_up(_cdiv(B, 2), 128))
        else:
            tb = B  # single full-array block: no padding, no (8,128) constraint
    else:
        tb = budget_tb  # multiple of 128 -> multi-block tiling is legal
    n_tiles = _cdiv(B, tb)

    # ---- block specs -------------------------------------------------------
    # x marches along the batch grid axis in its natural layout (contiguous DMA);
    # ragged last block is handled by Pallas (garbage rows stay in their own
    # lane columns and are masked out of the ragged output write).
    x_spec = pl.BlockSpec((tb, n_features), lambda i: (i, 0))
    # Weights/biases pinned in VMEM for the whole grid (constant index_map).
    param_specs = []
    for w, b in zip(ws, bs):
        param_specs.append(pl.BlockSpec(w.shape, lambda i: (0, 0)))
        param_specs.append(pl.BlockSpec(b.shape, lambda i: (0, 0)))
    # Lane-dense (1, B) output; reshaped to (B, 1) outside at zero cost.
    out_spec = pl.BlockSpec((1, tb), lambda i: (0, i))

    # ---- VMEM limit & cost hint -------------------------------------------
    x_block_bytes = tb * n_features * itemsize
    interm_bytes = tb * (n_features + 16 + 8 + 4 + 1) * 4
    out_block_bytes = tb * 4
    vmem_need = 2 * x_block_bytes + interm_bytes + 2 * out_block_bytes + (2 << 20)
    # >= v5e's 16 MiB scoped default, <= 48 MiB (safe under v7x's 64 MiB physical).
    vmem_limit_bytes = int(min(max(vmem_need, 16 << 20), 48 << 20))

    param_bytes = sum(int(a.size) * a.dtype.itemsize for a in ws + bs)
    cost = pl.CostEstimate(
        flops=2 * B * (n_features * 16 + 16 * 8 + 8 * 4 + 4 * 1),
        transcendentals=B,                                   # sigmoid
        bytes_accessed=int(x.size) * itemsize + param_bytes + B * 4,
    )

    out_t = pl.pallas_call(
        mlp_kernel,
        out_shape=jax.ShapeDtypeStruct((1, B), jnp.float32),
        grid=(n_tiles,),
        in_specs=[x_spec] + param_specs,
        out_specs=out_spec,
        compiler_params=pltpu.CompilerParams(
            dimension_semantics=("parallel",),               # v7x: shard batch blocks over 2 TCs
            vmem_limit_bytes=vmem_limit_bytes),
        cost_estimate=cost,
    )(x, ws[0], bs[0], ws[1], bs[1], ws[2], bs[2], ws[3], bs[3])

    return out_t.reshape(B, 1)


def init_params(key, n_features):
    """PyTorch nn.Linear default init (U[-1/sqrt(fan_in), 1/sqrt(fan_in)]).
    Weights stored PyTorch-style: (out_features, in_features); bias (out_features,)."""
    dims = [(n_features, 16), (16, 8), (8, 4), (4, 1)]
    params = {}
    for i, (fan_in, fan_out) in enumerate(dims, start=1):
        key, kw, kb = jax.random.split(key, 3)
        bound = 1.0 / float(fan_in) ** 0.5
        params[f"w{i}"] = jax.random.uniform(
            kw, (fan_out, fan_in), jnp.float32, -bound, bound)
        params[f"b{i}"] = jax.random.uniform(
            kb, (fan_out,), jnp.float32, -bound, bound)
    return params


def reference_forward(x, params):
    """Plain-JAX reference (matches torch F.linear semantics)."""
    h = jnp.maximum(x @ params["w1"].T + params["b1"], 0.0)
    h = jnp.maximum(h @ params["w2"].T + params["b2"], 0.0)
    h = jnp.maximum(h @ params["w3"].T + params["b3"], 0.0)
    return jax.nn.sigmoid(h @ params["w4"].T + params["b4"])


if __name__ == "__main__":
    key = jax.random.PRNGKey(0)
    batch, n_features = 8, 32

    key, kx, kp = jax.random.split(key, 3)
    x = jax.random.normal(kx, (batch, n_features), jnp.float32)
    params = init_params(kp, n_features)

    out = net_forward(x, params)
    out = jax.block_until_ready(out)

    ref = reference_forward(x, params)
    assert out.shape == (batch, 1)
    assert jnp.allclose(out, ref, atol=1e-5, rtol=1e-5)

    print("KERNEL_OK")
</pallas_src>

<mosaic_0001>
module attributes {stable_mosaic.version = 11 : i64} {
  func.func @mlp_kernel(%arg0: i32, %arg1: memref<8x32xf32, #tpu.memory_space<vmem>>, %arg2: memref<16x32xf32, #tpu.memory_space<vmem>>, %arg3: memref<16x1xf32, #tpu.memory_space<vmem>>, %arg4: memref<8x16xf32, #tpu.memory_space<vmem>>, %arg5: memref<8x1xf32, #tpu.memory_space<vmem>>, %arg6: memref<4x8xf32, #tpu.memory_space<vmem>>, %arg7: memref<4x1xf32, #tpu.memory_space<vmem>>, %arg8: memref<1x4xf32, #tpu.memory_space<vmem>>, %arg9: memref<1x1xf32, #tpu.memory_space<vmem>>, %arg10: memref<1x8xf32, #tpu.memory_space<vmem>>) attributes {dimension_semantics = [#tpu.dimension_semantics<parallel>], iteration_bounds = array<i64: 1>, scalar_prefetch = 0 : i64, scratch_operands = 0 : i64, tpu.core_type = #tpu.core_type<tc>, window_params = [{transform_indices = @transform_0, window_bounds = array<i64: 8, 32>}, {pipeline_mode = #tpu.pipeline_mode<synchronous>, transform_indices = @transform_1, window_bounds = array<i64: 16, 32>}, {pipeline_mode = #tpu.pipeline_mode<synchronous>, transform_indices = @transform_2, window_bounds = array<i64: 16, 1>}, {pipeline_mode = #tpu.pipeline_mode<synchronous>, transform_indices = @transform_3, window_bounds = array<i64: 8, 16>}, {pipeline_mode = #tpu.pipeline_mode<synchronous>, transform_indices = @transform_4, window_bounds = array<i64: 8, 1>}, {pipeline_mode = #tpu.pipeline_mode<synchronous>, transform_indices = @transform_5, window_bounds = array<i64: 4, 8>}, {pipeline_mode = #tpu.pipeline_mode<synchronous>, transform_indices = @transform_6, window_bounds = array<i64: 4, 1>}, {pipeline_mode = #tpu.pipeline_mode<synchronous>, transform_indices = @transform_7, window_bounds = array<i64: 1, 4>}, {pipeline_mode = #tpu.pipeline_mode<synchronous>, transform_indices = @transform_8, window_bounds = array<i64: 1, 1>}, {transform_indices = @transform_9, window_bounds = array<i64: 1, 8>}]} {
    %c0 = arith.constant 0 : index
    %c0_0 = arith.constant 0 : index
    %0 = vector.load %arg1[%c0, %c0_0] : memref<8x32xf32, #tpu.memory_space<vmem>>, vector<8x32xf32>
    %c0_1 = arith.constant 0 : index
    %c0_2 = arith.constant 0 : index
    %1 = vector.load %arg2[%c0_1, %c0_2] : memref<16x32xf32, #tpu.memory_space<vmem>>, vector<16x32xf32>
    %cst = arith.constant dense<0.000000e+00> : vector<16x8xf32>
    %2 = tpu.matmul %1, %0, %cst {dimension_numbers = #tpu.dot_dimension_numbers<[1], [1], [0], [0], [0, 0, 1, 0], [], []>} : vector<16x32xf32>, vector<8x32xf32>, vector<16x8xf32> -> vector<16x8xf32>
    %c0_3 = arith.constant 0 : index
    %c0_4 = arith.constant 0 : index
    %3 = vector.load %arg3[%c0_3, %c0_4] : memref<16x1xf32, #tpu.memory_space<vmem>>, vector<16x1xf32>
    %4 = vector.broadcast %3 : vector<16x1xf32> to vector<16x8xf32>
    %5 = arith.addf %2, %4 : vector<16x8xf32>
    %cst_5 = arith.constant 0.000000e+00 : f32
    %6 = vector.broadcast %cst_5 : f32 to vector<16x8xf32>
    %7 = arith.maximumf %5, %6 : vector<16x8xf32>
    %c0_6 = arith.constant 0 : index
    %c0_7 = arith.constant 0 : index
    %8 = vector.load %arg4[%c0_6, %c0_7] : memref<8x16xf32, #tpu.memory_space<vmem>>, vector<8x16xf32>
    %cst_8 = arith.constant dense<0.000000e+00> : vector<8x8xf32>
    %9 = tpu.matmul %8, %7, %cst_8 {dimension_numbers = #tpu.dot_dimension_numbers<[1], [0], [0], [1], [0, 0, 1, 1], [], []>} : vector<8x16xf32>, vector<16x8xf32>, vector<8x8xf32> -> vector<8x8xf32>
    %c0_9 = arith.constant 0 : index
    %c0_10 = arith.constant 0 : index
    %10 = vector.load %arg5[%c0_9, %c0_10] : memref<8x1xf32, #tpu.memory_space<vmem>>, vector<8x1xf32>
    %11 = vector.broadcast %10 : vector<8x1xf32> to vector<8x8xf32>
    %12 = arith.addf %9, %11 : vector<8x8xf32>
    %cst_11 = arith.constant 0.000000e+00 : f32
    %13 = vector.broadcast %cst_11 : f32 to vector<8x8xf32>
    %14 = arith.maximumf %12, %13 : vector<8x8xf32>
    %c0_12 = arith.constant 0 : index
    %c0_13 = arith.constant 0 : index
    %15 = vector.load %arg6[%c0_12, %c0_13] : memref<4x8xf32, #tpu.memory_space<vmem>>, vector<4x8xf32>
    %cst_14 = arith.constant dense<0.000000e+00> : vector<4x8xf32>
    %16 = tpu.matmul %15, %14, %cst_14 {dimension_numbers = #tpu.dot_dimension_numbers<[1], [0], [0], [1], [0, 0, 1, 1], [], []>} : vector<4x8xf32>, vector<8x8xf32>, vector<4x8xf32> -> vector<4x8xf32>
    %c0_15 = arith.constant 0 : index
    %c0_16 = arith.constant 0 : index
    %17 = vector.load %arg7[%c0_15, %c0_16] : memref<4x1xf32, #tpu.memory_space<vmem>>, vector<4x1xf32>
    %18 = vector.broadcast %17 : vector<4x1xf32> to vector<4x8xf32>
    %19 = arith.addf %16, %18 : vector<4x8xf32>
    %cst_17 = arith.constant 0.000000e+00 : f32
    %20 = vector.broadcast %cst_17 : f32 to vector<4x8xf32>
    %21 = arith.maximumf %19, %20 : vector<4x8xf32>
    %c0_18 = arith.constant 0 : index
    %c0_19 = arith.constant 0 : index
    %22 = vector.load %arg8[%c0_18, %c0_19] : memref<1x4xf32, #tpu.memory_space<vmem>>, vector<1x4xf32>
    %cst_20 = arith.constant dense<0.000000e+00> : vector<1x8xf32>
    %23 = tpu.matmul %22, %21, %cst_20 {dimension_numbers = #tpu.dot_dimension_numbers<[1], [0], [0], [1], [0, 0, 1, 1], [], []>} : vector<1x4xf32>, vector<4x8xf32>, vector<1x8xf32> -> vector<1x8xf32>
    %c0_21 = arith.constant 0 : index
    %c0_22 = arith.constant 0 : index
    %24 = vector.load %arg9[%c0_21, %c0_22] : memref<1x1xf32, #tpu.memory_space<vmem>>, vector<1x1xf32>
    %25 = vector.broadcast %24 : vector<1x1xf32> to vector<1x8xf32>
    %26 = arith.addf %23, %25 : vector<1x8xf32>
    %27 = arith.negf %26 : vector<1x8xf32>
    %28 = math.exp %27 : vector<1x8xf32>
    %cst_23 = arith.constant 1.000000e+00 : f32
    %29 = vector.broadcast %cst_23 : f32 to vector<1x8xf32>
    %30 = arith.addf %29, %28 : vector<1x8xf32>
    %31 = arith.divf %29, %30 : vector<1x8xf32>
    %c0_24 = arith.constant 0 : index
    %c0_25 = arith.constant 0 : index
    %32 = vector.load %arg10[%c0_24, %c0_25] : memref<1x8xf32, #tpu.memory_space<vmem>>, vector<1x8xf32>
    tpu.vector_store %arg10[%c0_24, %c0_25], %31 {strides = array<i32>} : memref<1x8xf32, #tpu.memory_space<vmem>>, vector<1x8xf32>,
    return
  }
  func.func @transform_0(%arg0: i32) -> (i32, i32) {
    %c0_i32 = arith.constant 0 : i32
    %c0_i32_0 = arith.constant 0 : i32
    return %arg0, %c0_i32 : i32, i32
  }
  func.func @transform_1(%arg0: i32) -> (i32, i32) {
    %c0_i32 = arith.constant 0 : i32
    %c0_i32_0 = arith.constant 0 : i32
    %c0_i32_1 = arith.constant 0 : i32
    return %c0_i32, %c0_i32_0 : i32, i32
  }
  func.func @transform_2(%arg0: i32) -> (i32, i32) {
    %c0_i32 = arith.constant 0 : i32
    %c0_i32_0 = arith.constant 0 : i32
    %c0_i32_1 = arith.constant 0 : i32
    return %c0_i32, %c0_i32_0 : i32, i32
  }
  func.func @transform_3(%arg0: i32) -> (i32, i32) {
    %c0_i32 = arith.constant 0 : i32
    %c0_i32_0 = arith.constant 0 : i32
    %c0_i32_1 = arith.constant 0 : i32
    return %c0_i32, %c0_i32_0 : i32, i32
  }
  func.func @transform_4(%arg0: i32) -> (i32, i32) {
    %c0_i32 = arith.constant 0 : i32
    %c0_i32_0 = arith.constant 0 : i32
    %c0_i32_1 = arith.constant 0 : i32
    return %c0_i32, %c0_i32_0 : i32, i32
  }
  func.func @transform_5(%arg0: i32) -> (i32, i32) {
    %c0_i32 = arith.constant 0 : i32
    %c0_i32_0 = arith.constant 0 : i32
    %c0_i32_1 = arith.constant 0 : i32
    return %c0_i32, %c0_i32_0 : i32, i32
  }
  func.func @transform_6(%arg0: i32) -> (i32, i32) {
    %c0_i32 = arith.constant 0 : i32
    %c0_i32_0 = arith.constant 0 : i32
    %c0_i32_1 = arith.constant 0 : i32
    return %c0_i32, %c0_i32_0 : i32, i32
  }
  func.func @transform_7(%arg0: i32) -> (i32, i32) {
    %c0_i32 = arith.constant 0 : i32
    %c0_i32_0 = arith.constant 0 : i32
    %c0_i32_1 = arith.constant 0 : i32
    return %c0_i32, %c0_i32_0 : i32, i32
  }
  func.func @transform_8(%arg0: i32) -> (i32, i32) {
    %c0_i32 = arith.constant 0 : i32
    %c0_i32_0 = arith.constant 0 : i32
    %c0_i32_1 = arith.constant 0 : i32
    return %c0_i32, %c0_i32_0 : i32, i32
  }
  func.func @transform_9(%arg0: i32) -> (i32, i32) {
    %c0_i32 = arith.constant 0 : i32
    %c0_i32_0 = arith.constant 0 : i32
    return %c0_i32, %arg0 : i32, i32
  }
}

</mosaic_0001>

<bundles_post_ra>
// kernel: tpu_custom_call.1
= control target key start
LH: loop header
LB: loop body
LE: loop exit
PB: predicated region body
PF: predicated region fallthrough
CT: control target
= control target key end

     0   :  { %s577_s0 = inlined_call_operand.vmem [shape: f32[8,32], index: 0, kind: input, shape index: {}]   ;;  %s578_s1 = inlined_call_operand.vmem [shape: f32[16,32], index: 1, kind: input, shape index: {}]   ;;  %s579_s2 = inlined_call_operand.vmem [shape: f32[16,1], index: 2, kind: input, shape index: {}]   ;;  %s580_s3 = inlined_call_operand.vmem [shape: f32[8,16], index: 3, kind: input, shape index: {}]   ;;  %s581_s4 = inlined_call_operand.vmem [shape: f32[8,1], index: 4, kind: input, shape index: {}]   ;;  %s582_s5 = inlined_call_operand.vmem [shape: f32[4,8], index: 5, kind: input, shape index: {}]   ;;  %s583_s6 = inlined_call_operand.vmem [shape: f32[4,1], index: 6, kind: input, shape index: {}]   ;;  %s584_s7 = inlined_call_operand.vmem [shape: f32[1,4], index: 7, kind: input, shape index: {}]   ;;  %s585_s8 = inlined_call_operand.<no memory space> [shape: f32[1,1], index: 8, kind: input, shape index: {}]   ;;  %s586_s9 = inlined_call_operand.hbm [shape: f32[1,8], index: 9, kind: output, shape index: {}]  }
   0x1   :  { %v14_v0 = vstv %s585_s8 }
   0x2   :  { %15 = vst [vmem:[#allocation2] sm:$0x1] %v14_v0 }
   0x3   :  { %v35_v1 = vld [vmem:[%s577_s0] sm:$0xff]  ;;  %vm50_vm0 = vcmask 261120   ;;  %v39_v3 = vld [vmem:[%s579_s2 + $0x8] sm:$0xff]  ;;  %v484_v5 = vmov 0  }
   0x4   :  { %v36_v2 = vld [vmem:[%s578_s1] sm:$0xff]  ;;  %430 = vmatprep.subr.msk.mxu0 %vm50_vm0, %v35_v1  ;;  %v37_v4 = vld [vmem:[%s578_s1 + $0x8] sm:$0xff]  ;;  %456 = vset.pattern.permute.xlu0 %v484_v5 }
   0x5   :  { %432 = vmatprep.mubr.msk.f32.mxu0 %vm50_vm0, %v36_v2  ;;  %431 = vmatpush3.xpose.msk.msra.mxu0 %vm50_vm0, %v35_v1 }
   0x6   :  { %16 = vsyncpa [#allocation4], 0  ;;  %47 = vperm.xlu0 %456, %v39_v3   ;;  %457 = vset.pattern.permute.xlu1 %v484_v5  ;;  %v38_v6 = vld [vmem:[%s579_s2] sm:$0xff]  ;;  %v485_v8 = vmov 0.0   ;;  %vm486_vm1 = vmmov 0   ;;  %vm144_vm2 = vcmask 130048   ;;  %v308_v32 = vlaneseq }
   0x7   :  { %435 = vmatprep.subr.mxu1 %v485_v8  ;;  %442 = vmatprep.subr.mxu0 %v485_v8  ;;  %v138_v9 = vld [vmem:[%s581_s4] sm:$0xff]  ;;  %vm226_vm3 = vcmask 64512   ;;  %vm316_vm4 = vcmask 1043456   ;;  %vm312_vm5 = vcmask 31744   ;;  %vm396_vm6 = vcmask 57344  }
   0x8   :  { %433 = vmatmul.mubr.msk.f32.vlgmr.msra.gmra.mxu0 %vm50_vm0, %v37_v4  ;;  %439 = vmatprep.mubr.msk.f32.mxu1 %vm486_vm1, %v485_v8  ;;  %v220_v10 = vld [vmem:[%s583_s6] sm:$0xf]  ;;  %v309_v33 = vshrl.u32 %v308_v32, 7 }
   0x9   :  { %v302_v7 = vld [vmem:[#allocation2] sm:$0x1]  ;;  %444 = vmatprep.mubr.msk.f32.mxu0 %vm486_vm1, %v485_v8  ;;  %141 = vperm.xlu1 %457, %v138_v9  }
   0xa   :  { %42 = vperm.xlu0 %456, %v38_v6   ;;  %v137_v19 = vld [vmem:[%s580_s3] sm:$0xff]  ;;  %v310_v34 = vsub.s32 0, %v309_v33 }
   0xb   :  { %v219_v25 = vld [vmem:[%s582_s5] sm:$0xf]  ;;  %s487_s5 = smov [#allocation3]  }
   0xc   :  { %v301_v31 = vld [vmem:[%s584_s7] sm:$0x1]  ;;  %s404_s24 = sshll.u32 %s487_s5, 4  ;;  %s405_s24 = int_to_ptr.vmem [resolvable:$true] %s404_s24 }
   0xd   :  { %223 = vperm.xlu1 %457, %v220_v10   ;;  %s462_s7 = scalar_lea.vmem %s405_s24, 16  ;;  %s466_s25 = scalar_lea.vmem %s405_s24, 32 }
   0xe   :  { %305 = vperm.xlu0 %456, %v302_v7   ;;  %p463_p0 = scmp.ne.s32.totalorder %s405_s24, %s462_s7  ;;  %p467_p1 = scmp.lt.s32.totalorder %s405_s24, %s405_s24 }
   0xf   :  { %p468_p2 = scmp.lt.s32.totalorder %s466_s25, %s462_s7 }
  0x11   :  { %p469_p3 = por %p468_p2, %p467_p1 }
  0x13   :  { %p470_p4 = pnand %p469_p3, %p463_p0 }
  0x81   :  { %v48_v11 = vpop.permute.xlu0 %47 }
  0x84   :  { %v142_v20 = vpop.permute.xlu1 %141 }
  0x85   :  { %v43_v14 = vpop.permute.xlu0 %42 }
  0x88   :  { %v224_v26 = vpop.permute.xlu1 %223 }
  0x89   :  { %v306_v35 = vpop.permute.xlu0 %305 }
  0x8a   :  { %v311_v36 = vrot.slane %v306_v35, %v310_v34 }
  0xc8   :  { %v434_v12 = vpop.f32.mrf.mxu0 }
  0xc9   :  { %v132_v13 = vadd.f32 %v434_v12, %v48_v11 }
  0xca   :  { %v126_v15 = vpop.f32.mrf.mxu0 }
  0xcb   :  { %v136_v16 = vmax.f32 %v132_v13, 0.0  ;;  %v127_v17 = vadd.f32 %v126_v15, %v43_v14 }
  0xcd   :  { %v135_v18 = vmax.f32 %v127_v17, 0.0  ;;  %436 = vmatpush3.msra.mxu1 %v136_v16 }
  0xce   :  { %437 = vmatprep.subr.mxu1 %v485_v8 }
  0xcf   :  { %438 = vmatpush3.msra.mxu1 %v135_v18 }
  0xd0   :  { %440 = vmatmul.mubr.msk.f32.vlgmr.msra.gmra.mxu1 %vm144_vm2, %v137_v19  ;;  %447 = vmatprep.subr.mxu1 %v485_v8 }
  0xd1   :  { %449 = vmatprep.mubr.msk.f32.mxu1 %vm486_vm1, %v485_v8 }
 0x190   :  { %v214_v21 = vpop.f32.mrf.mxu1 }
 0x191   :  { %v215_v22 = vadd.f32 %v214_v21, %v142_v20 }
 0x192   :  { %v441_v23 = vpop.f32.mrf.mxu1 }
 0x193   :  { %v218_v24 = vmax.f32 %v215_v22, 0.0 }
 0x195   :  { %443 = vmatpush3.msra.mxu0 %v218_v24 }
 0x196   :  { %445 = vmatmul.mubr.msk.f32.vlgmr.msra.gmra.mxu0 %vm226_vm3, %v219_v25 }
 0x256   :  { %v296_v27 = vpop.f32.mrf.mxu0 }
 0x257   :  { %v297_v28 = vadd.f32 %v296_v27, %v224_v26 }
 0x258   :  { %v446_v29 = vpop.f32.mrf.mxu0 }
 0x259   :  { %v300_v30 = vmax.f32 %v297_v28, 0.0 }
 0x25b   :  { %448 = vmatpush3.msk.msra.mxu1 %vm316_vm4, %v300_v30 }
 0x25c   :  { %450 = vmatmul.mubr.msk.f32.vlgmr.msra.gmra.mxu1 %vm312_vm5, %v301_v31 }
 0x31c   :  { %v386_v37 = vpop.f32.mrf.mxu1 }
 0x31d   :  { %v387_v38 = vadd.f32 %v386_v37, %v311_v36 }
 0x31e   :  { %v451_v39 = vpop.f32.mrf.mxu1 }
 0x31f   :  { %v419_v40 = vmul.f32 -1.442695, %v387_v38 }
 0x321   :  { %458 = vpow2.f32 %v419_v40 }
 0x32e   :  { %v459_v41 = vpop.eup %458 }
 0x32f   :  { %v393_v42 = vadd.f32 1.0, %v459_v41 }
 0x331   :  { %460 = vrcp.f32 %v393_v42 }
 0x33e   :  { %v461_v43 = vpop.eup %460 }
 0x33f   :  { %397 = vst.msk [vmem:[#allocation3] sm:$0x1] %vm396_vm6, %v461_v43 }
 0x340   :  { %473 = shalt.err (!%p470_p4)
}
 0x341   :  { %407 = dma.vmem_to_hbm [thread:$0]  %s405_s24, 16, %s586_s9, [#allocation4]  }
 0x342   :  { %482 = dma.done.wait [#allocation4], 16  }
 0x343   :  { %483 = vsyncadd [#allocation4], 4294967280 }
 0x344   :  { %411 = vsyncpa [#allocation4], 1 }

</bundles_post_ra>
